<compile_context>
chip_gen: v6e
topology: v6e:2x2x1
jax: 0.10.0
libtpu: 0.0.40
codegen_flags: <defaults>
</compile_context>

<pallas_src>
import functools

import jax
import jax.numpy as jnp
from jax.experimental import pallas as pl
from jax.experimental.pallas import tpu as pltpu


# ---------------------------------------------------------------------------
# Helpers: padding / tile selection
# ---------------------------------------------------------------------------
def _round_up(x, m):
    return ((x + m - 1) // m) * m


_TK_CANDIDATES = (2048, 1024, 512, 256, 128)
# Conservative: fits the default scoped-VMEM limit on v5e (16 MiB) and leaves
# plenty of headroom on v6e/v7x, so no vmem_limit_bytes override is needed.
_VMEM_BUDGET_BYTES = 10 * 1024 * 1024


def _pick_tk(cp, hw128, itemsize):
    """Largest contraction tile fitting budget: 2x (Cp,tk) feature buffers
    (double-buffered pipeline) + (Cp,Cp) f32 accumulator + (Cp,Cp) target."""
    for tk in _TK_CANDIDATES:
        if tk > hw128 and tk != 128:
            continue
        need = 2 * cp * tk * itemsize + 2 * cp * cp * 4
        if need <= _VMEM_BUDGET_BYTES:
            return tk
    return 128


def _prep_features(x, compute_dtype):
    """NCHW (batch==1, matching torch's .view(c, h*w)) -> zero-padded (Cp, HWp)."""
    b, c, h, w = x.shape
    assert b == 1, "StyleLoss.gram_matrix (view(c, h*w)) requires batch == 1"
    hw = h * w
    f = x.reshape(c, hw).astype(compute_dtype)
    cp = _round_up(c, 128)                       # lane-dense output, full MXU rows
    hw128 = _round_up(hw, 128)
    tk = _pick_tk(cp, hw128, jnp.dtype(compute_dtype).itemsize)
    hwp = _round_up(hw, tk)                      # no divisibility restriction on H*W
    f = jnp.pad(f, ((0, cp - c), (0, hwp - hw)))  # zero pad: contributes 0 to G/MSE
    return f, tk, c, hw


# ---------------------------------------------------------------------------
# Kernel 1: gram only (used once, to build the cached target gram)
#   G = (F @ F.T) * scale, accumulated over the H*W axis
# ---------------------------------------------------------------------------
def _gram_kernel(f_ref, g_ref, acc_ref, *, scale):
    k = pl.program_id(0)

    @pl.when(k == 0)
    def _():
        acc_ref[...] = jnp.zeros_like(acc_ref)

    f = f_ref[...]  # (Cp, tk) tile of the features
    # Contract axis 1 of both operands (trans_b on the MXU) -- no f.T transpose.
    acc_ref[...] += jax.lax.dot_general(
        f, f,
        dimension_numbers=(((1,), (1,)), ((), ())),
        preferred_element_type=jnp.float32)

    @pl.when(k == pl.num_programs(0) - 1)
    def _():
        g_ref[...] = (acc_ref[...] * scale).astype(g_ref.dtype)


def _gram_padded(fp, tk, scale):
    cp, hwp = fp.shape
    kernel = functools.partial(_gram_kernel, scale=scale)
    return pl.pallas_call(
        kernel,
        out_shape=jax.ShapeDtypeStruct((cp, cp), jnp.float32),
        grid=(hwp // tk,),
        in_specs=[pl.BlockSpec((cp, tk), lambda k: (0, k))],
        out_specs=pl.BlockSpec((cp, cp), lambda k: (0, 0)),
        scratch_shapes=[pltpu.VMEM((cp, cp), jnp.float32)],
        compiler_params=pltpu.CompilerParams(
            dimension_semantics=("arbitrary",)),
    )(fp)


# ---------------------------------------------------------------------------
# Kernel 2 (forward): fused gram + MSE against the resident target gram.
#   loss = sum((G - target)^2) / C^2   (padded rows/cols are zero in both)
# ---------------------------------------------------------------------------
def _gram_mse_kernel(f_ref, t_ref, loss_ref, acc_ref, *, scale, inv_nsq):
    k = pl.program_id(0)

    @pl.when(k == 0)
    def _():
        acc_ref[...] = jnp.zeros_like(acc_ref)

    f = f_ref[...]  # (Cp, tk)
    acc_ref[...] += jax.lax.dot_general(
        f, f,
        dimension_numbers=(((1,), (1,)), ((), ())),
        preferred_element_type=jnp.float32)

    @pl.when(k == pl.num_programs(0) - 1)
    def _():
        d = acc_ref[...] * scale - t_ref[...]
        loss_ref[0, 0] = jnp.sum(d * d) * inv_nsq


def _style_loss_fused(fp, target_gram_padded, tk, scale, inv_nsq):
    cp, hwp = fp.shape
    kernel = functools.partial(_gram_mse_kernel, scale=scale, inv_nsq=inv_nsq)
    loss = pl.pallas_call(
        kernel,
        out_shape=jax.ShapeDtypeStruct((1, 1), jnp.float32),
        grid=(hwp // tk,),
        in_specs=[
            pl.BlockSpec((cp, tk), lambda k: (0, k)),     # streamed features
            pl.BlockSpec((cp, cp), lambda k: (0, 0)),     # resident target gram
        ],
        out_specs=pl.BlockSpec((1, 1), lambda k: (0, 0),
                               memory_space=pltpu.MemorySpace.SMEM),
        scratch_shapes=[pltpu.VMEM((cp, cp), jnp.float32)],
        compiler_params=pltpu.CompilerParams(
            dimension_semantics=("arbitrary",)),
    )(fp, target_gram_padded)
    return loss[0, 0]


# ---------------------------------------------------------------------------
# StyleLoss module (mirrors the PyTorch nn.Module semantics)
# ---------------------------------------------------------------------------
class StyleLoss:
    def __init__(self, target_feature, compute_dtype=jnp.float32):
        self.compute_dtype = compute_dtype
        b, c, h, w = target_feature.shape
        fp, tk, c_true, hw_true = _prep_features(target_feature, compute_dtype)
        # target gram is computed once and "detached" (no grads through it)
        self.target = jax.lax.stop_gradient(
            _gram_padded(fp, tk, 1.0 / float(c_true * hw_true)))
        self.loss = None

    def __call__(self, x):
        fp, tk, c, hw = _prep_features(x, self.compute_dtype)
        scale = 1.0 / float(c * hw)
        inv_nsq = 1.0 / float(c * c)
        self.loss = _style_loss_fused(fp, self.target, tk, scale, inv_nsq)
        return x  # forward returns the input unchanged


# ---------------------------------------------------------------------------
if __name__ == "__main__":
    key = jax.random.PRNGKey(0)
    k_tgt, k_in = jax.random.split(key)

    # Small shapes consistent with the module: NCHW with N=1
    # (the original .view(c, h*w) only works for batch == 1).
    B, C, H, W = 1, 8, 16, 16
    target_feature = jax.random.normal(k_tgt, (B, C, H, W), dtype=jnp.float32)
    x = jax.random.normal(k_in, (B, C, H, W), dtype=jnp.float32)

    # Reference in plain JAX (same math as the PyTorch module).
    def ref_gram(inp):
        b, c, h, w = inp.shape
        f = inp.reshape(c, h * w)
        return (f @ f.T) / (c * h * w)

    g_ref = ref_gram(x)
    t_ref = ref_gram(target_feature)
    loss_ref = jnp.mean((g_ref - t_ref) ** 2)

    # f32 path (default)
    style = StyleLoss(target_feature)
    out = jax.block_until_ready(style(x))
    loss = jax.block_until_ready(style.loss)
    assert out.shape == x.shape and jnp.allclose(out, x)
    assert jnp.allclose(loss, loss_ref, rtol=1e-5, atol=1e-6), (loss, loss_ref)

    # bf16 feature path (full MXU rate on v6e/v7x), f32 accumulation.
    style_bf16 = StyleLoss(target_feature, compute_dtype=jnp.bfloat16)
    _ = jax.block_until_ready(style_bf16(x))
    loss_bf16 = jax.block_until_ready(style_bf16.loss)
    assert jnp.allclose(loss_bf16, loss_ref, rtol=5e-2, atol=1e-4), (
        loss_bf16, loss_ref)

    print("KERNEL_OK")
</pallas_src>

<mosaic_0001>
module attributes {stable_mosaic.version = 11 : i64} {
  func.func @_gram_kernel(%arg0: i32, %arg1: memref<128x256xf32, #tpu.memory_space<vmem>>, %arg2: memref<128x128xf32, #tpu.memory_space<vmem>>, %arg3: memref<128x128xf32, #tpu.memory_space<vmem>>) attributes {dimension_semantics = [#tpu.dimension_semantics<arbitrary>], iteration_bounds = array<i64: 1>, scalar_prefetch = 0 : i64, scratch_operands = 1 : i64, tpu.core_type = #tpu.core_type<tc>, window_params = [{transform_indices = @transform_0, window_bounds = array<i64: 128, 256>}, {pipeline_mode = #tpu.pipeline_mode<synchronous>, transform_indices = @transform_1, window_bounds = array<i64: 128, 128>}]} {
    %c0_i32 = arith.constant 0 : i32
    %0 = arith.cmpi eq, %arg0, %c0_i32 : i32
    %1 = arith.extui %0 : i1 to i32
    %c0_i32_0 = arith.constant 0 : i32
    %2 = arith.cmpi ne, %1, %c0_i32_0 : i32
    scf.if %2 {
      %cst_8 = arith.constant 0.000000e+00 : f32
      %11 = vector.broadcast %cst_8 : f32 to vector<128x128xf32>
      %c0_9 = arith.constant 0 : index
      %c0_10 = arith.constant 0 : index
      %12 = vector.load %arg3[%c0_9, %c0_10] : memref<128x128xf32, #tpu.memory_space<vmem>>, vector<128x128xf32>
      tpu.vector_store %arg3[%c0_9, %c0_10], %11 {strides = array<i32>} : memref<128x128xf32, #tpu.memory_space<vmem>>, vector<128x128xf32>,
    } else {
    }
    %c0 = arith.constant 0 : index
    %c0_1 = arith.constant 0 : index
    %3 = vector.load %arg1[%c0, %c0_1] : memref<128x256xf32, #tpu.memory_space<vmem>>, vector<128x256xf32>
    %c0_2 = arith.constant 0 : index
    %c0_3 = arith.constant 0 : index
    %4 = vector.load %arg3[%c0_2, %c0_3] : memref<128x128xf32, #tpu.memory_space<vmem>>, vector<128x128xf32>
    %cst = arith.constant dense<0.000000e+00> : vector<128x128xf32>
    %5 = tpu.matmul %3, %3, %cst {dimension_numbers = #tpu.dot_dimension_numbers<[1], [1], [0], [0], [0, 0, 1, 0], [], []>} : vector<128x256xf32>, vector<128x256xf32>, vector<128x128xf32> -> vector<128x128xf32>
    %6 = arith.addf %4, %5 : vector<128x128xf32>
    %c0_4 = arith.constant 0 : index
    %c0_5 = arith.constant 0 : index
    %7 = vector.load %arg3[%c0_4, %c0_5] : memref<128x128xf32, #tpu.memory_space<vmem>>, vector<128x128xf32>
    tpu.vector_store %arg3[%c0_4, %c0_5], %6 {strides = array<i32>} : memref<128x128xf32, #tpu.memory_space<vmem>>, vector<128x128xf32>,
    %c0_i32_6 = arith.constant 0 : i32
    %8 = arith.cmpi eq, %arg0, %c0_i32_6 : i32
    %9 = arith.extui %8 : i1 to i32
    %c0_i32_7 = arith.constant 0 : i32
    %10 = arith.cmpi ne, %9, %c0_i32_7 : i32
    scf.if %10 {
      %c0_8 = arith.constant 0 : index
      %c0_9 = arith.constant 0 : index
      %11 = vector.load %arg3[%c0_8, %c0_9] : memref<128x128xf32, #tpu.memory_space<vmem>>, vector<128x128xf32>
      %cst_10 = arith.constant 4.8828125E-4 : f32
      %12 = vector.broadcast %cst_10 : f32 to vector<128x128xf32>
      %13 = arith.mulf %11, %12 : vector<128x128xf32>
      %c0_11 = arith.constant 0 : index
      %c0_12 = arith.constant 0 : index
      %14 = vector.load %arg2[%c0_11, %c0_12] : memref<128x128xf32, #tpu.memory_space<vmem>>, vector<128x128xf32>
      tpu.vector_store %arg2[%c0_11, %c0_12], %13 {strides = array<i32>} : memref<128x128xf32, #tpu.memory_space<vmem>>, vector<128x128xf32>,
    } else {
    }
    return
  }
  func.func @transform_0(%arg0: i32) -> (i32, i32) {
    %c0_i32 = arith.constant 0 : i32
    %c0_i32_0 = arith.constant 0 : i32
    return %c0_i32, %arg0 : i32, i32
  }
  func.func @transform_1(%arg0: i32) -> (i32, i32) {
    %c0_i32 = arith.constant 0 : i32
    %c0_i32_0 = arith.constant 0 : i32
    %c0_i32_1 = arith.constant 0 : i32
    return %c0_i32, %c0_i32_0 : i32, i32
  }
}

</mosaic_0001>

<bundles_post_ra>
// kernel: tpu_custom_call.1
= control target key start
LH: loop header
LB: loop body
LE: loop exit
PB: predicated region body
PF: predicated region fallthrough
CT: control target
= control target key end

     0   :  { %6 = vsyncpa [#allocation4], 0  ;;  %s520_s0 = inlined_call_operand.hbm [shape: f32[128,256], index: 0, kind: input, shape index: {}]   ;;  %s521_s1 = inlined_call_operand.hbm [shape: f32[128,128], index: 1, kind: output, shape index: {}]  }
   0x1   :  { %7 = vsyncpa [#allocation5], 0  ;;  %s418_s6 = smov [#allocation3]  }
   0x2   :  { %s13_s7 = sshll.u32 %s418_s6, 4  ;;  %s14_s7 = int_to_ptr.vmem [resolvable:$true] %s13_s7 }
   0x3   :  { %s382_s8 = scalar_lea.vmem %s14_s7, 4096  ;;  %p387_p1 = scmp.lt.s32.totalorder %s14_s7, %s14_s7 }
   0x4   :  { %p383_p0 = scmp.ne.s32.totalorder %s14_s7, %s382_s8  ;;  %p388_p2 = scmp.lt.s32.totalorder %s382_s8, %s382_s8 }
   0x6   :  { %p389_p3 = por %p388_p2, %p387_p1 }
   0x8   :  { %p390_p4 = pnand %p389_p3, %p383_p0 }
   0xa   :  { %393 = shalt.err (!%p390_p4)
}
   0xb   :  { %s419_s9 = smov 256   ;;  %s420_s10 = smov 16  }
   0xc   :  { %19 = dma.hbm_to_vmem [thread:$0]  %s520_s0, 4096, %s14_s7, [#allocation4], %s419_s9, %s419_s9, %s420_s10  }
   0xd   :  { %414 = dma.done.wait [#allocation4], 4096  }
   0xe   :  { %415 = vsyncadd [#allocation4], 4294963200  ;;  %v437_v0 = vld [vmem:[#allocation3 + $0xf8] sm:$0xff]  ;;  %v439_v1 = vld [vmem:[#allocation3 + $0xf0] sm:$0xff]  ;;  %s421_s0 = smov [#allocation6]  }
   0xf   :  { %v441_v2 = vld [vmem:[#allocation3 + $0xe8] sm:$0xff]  ;;  %91 = vmatprep.subr.mxu0 %v437_v0  ;;  %336 = vmatprep.subr.mxu1 %v437_v0  ;;  %v449_v3 = vld [vmem:[#allocation3 + $0xe0] sm:$0xff]  ;;  %v451_v4 = vld [vmem:[#allocation3 + $0xd8] sm:$0xff]  ;;  %s324_s13 = sshll.u32 %s421_s0, 4  ;;  %s325_s13 = int_to_ptr.vmem [resolvable:$true] %s324_s13 }
  0x10   :  { %92 = vmatpush1.xpose.msra.mxu0 %v439_v1  ;;  %352 = vmatpush1.xpose.msra.mxu1 %v439_v1  ;;  %v60_v5 = vld [vmem:[#allocation3 + $0x88] sm:$0xff]  ;;  %v457_v6 = vld [vmem:[#allocation3 + $0xd0] sm:$0xff]  ;;  %v465_v8 = vld [vmem:[#allocation3 + $0xc0] sm:$0xff]  ;;  %s394_s14 = scalar_lea.vmem %s325_s13, 2048  ;;  %p399_p6 = scmp.lt.s32.totalorder %s325_s13, %s325_s13 }
  0x11   :  { %93 = vmatprep.subr.mxu0 %v441_v2  ;;  %337 = vmatprep.subr.mxu1 %v441_v2  ;;  %v459_v7 = vld [vmem:[#allocation3 + $0xc8] sm:$0xff]  ;;  %v469_v10 = vld [vmem:[#allocation3 + $0xb8] sm:$0xff]  ;;  %v476_v11 = vld [vmem:[#allocation3 + $0xb0] sm:$0xff]  ;;  %p395_p5 = scmp.ne.s32.totalorder %s325_s13, %s394_s14  ;;  %p400_p7 = scmp.lt.s32.totalorder %s394_s14, %s394_s14 }
  0x12   :  { %195 = vmatprep.mubr.f32.mxu1 %v60_v5  ;;  %v467_v9 = vld [vmem:[#allocation3 + $0x8] sm:$0xff]  ;;  %v484_v13 = vld [vmem:[#allocation3 + $0xa0] sm:$0xff]  ;;  %v62_v14 = vld [vmem:[#allocation3 + $0x98] sm:$0xff] }
  0x13   :  { %155 = vmatprep.mubr.f32.mxu0 %v467_v9  ;;  %v478_v12 = vld [vmem:[#allocation3 + $0xa8] sm:$0xff]  ;;  %v61_v15 = vld [vmem:[#allocation3 + $0x90] sm:$0xff]  ;;  %v59_v16 = vld [vmem:[#allocation3 + $0x80] sm:$0xff]  ;;  %p401_p8 = por %p400_p7, %p399_p6 }
  0x14   :  { %94 = vmatpush1.xpose.msra.mxu0 %v449_v3  ;;  %353 = vmatpush1.xpose.msra.mxu1 %v449_v3  ;;  %v488_v17 = vld [vmem:[#allocation3 + $0x78] sm:$0xff]  ;;  %v492_v18 = vld [vmem:[#allocation3 + $0x70] sm:$0xff]  ;;  %v494_v19 = vld [vmem:[#allocation3 + $0x68] sm:$0xff] }
  0x15   :  { %95 = vmatprep.subr.mxu0 %v451_v4  ;;  %338 = vmatprep.subr.mxu1 %v451_v4  ;;  %v55_v20 = vld [vmem:[#allocation3 + $0x60] sm:$0xff]  ;;  %v54_v21 = vld [vmem:[#allocation3 + $0x58] sm:$0xff]  ;;  %v53_v22 = vld [vmem:[#allocation3 + $0x50] sm:$0xff]  ;;  %p402_p9 = pnand %p401_p8, %p395_p5 }
  0x16   :  { %v52_v23 = vld [vmem:[#allocation3 + $0x48] sm:$0xff]  ;;  %v51_v24 = vld [vmem:[#allocation3 + $0x40] sm:$0xff]  ;;  %v50_v25 = vld [vmem:[#allocation3 + $0x38] sm:$0xff] }
  0x17   :  { %v49_v26 = vld [vmem:[#allocation3 + $0x30] sm:$0xff]  ;;  %v48_v27 = vld [vmem:[#allocation3 + $0x28] sm:$0xff]  ;;  %v47_v28 = vld [vmem:[#allocation3 + $0x20] sm:$0xff] }
  0x18   :  { %96 = vmatpush1.xpose.msra.mxu0 %v457_v6  ;;  %354 = vmatpush1.xpose.msra.mxu1 %v457_v6  ;;  %v46_v29 = vld [vmem:[#allocation3 + $0x18] sm:$0xff]  ;;  %v45_v30 = vld [vmem:[#allocation3 + $0x10] sm:$0xff]  ;;  %v43_v31 = vld [vmem:[#allocation3] sm:$0xff] }
  0x19   :  { %97 = vmatprep.subr.mxu0 %v459_v7  ;;  %339 = vmatprep.subr.mxu1 %v459_v7 }
  0x1c   :  { %98 = vmatpush1.xpose.msra.mxu0 %v465_v8  ;;  %355 = vmatpush1.xpose.msra.mxu1 %v465_v8 }
  0x1d   :  { %99 = vmatprep.subr.mxu0 %v469_v10  ;;  %340 = vmatprep.subr.mxu1 %v469_v10 }
  0x20   :  { %100 = vmatpush1.xpose.msra.mxu0 %v476_v11  ;;  %356 = vmatpush1.xpose.msra.mxu1 %v476_v11 }
  0x21   :  { %101 = vmatprep.subr.mxu0 %v478_v12  ;;  %341 = vmatprep.subr.mxu1 %v478_v12 }
  0x24   :  { %102 = vmatpush1.xpose.msra.mxu0 %v484_v13  ;;  %357 = vmatpush1.xpose.msra.mxu1 %v484_v13 }
  0x25   :  { %103 = vmatprep.subr.mxu0 %v62_v14  ;;  %342 = vmatprep.subr.mxu1 %v62_v14 }
  0x28   :  { %104 = vmatpush1.xpose.msra.mxu0 %v61_v15  ;;  %358 = vmatpush1.xpose.msra.mxu1 %v61_v15 }
  0x29   :  { %105 = vmatprep.subr.mxu0 %v60_v5  ;;  %343 = vmatprep.subr.mxu1 %v60_v5 }
  0x2c   :  { %106 = vmatpush1.xpose.msra.mxu0 %v59_v16  ;;  %359 = vmatpush1.xpose.msra.mxu1 %v59_v16 }
  0x2d   :  { %107 = vmatprep.subr.mxu0 %v488_v17  ;;  %344 = vmatprep.subr.mxu1 %v488_v17 }
  0x30   :  { %108 = vmatpush1.xpose.msra.mxu0 %v492_v18  ;;  %360 = vmatpush1.xpose.msra.mxu1 %v492_v18 }
  0x31   :  { %109 = vmatprep.subr.mxu0 %v494_v19  ;;  %345 = vmatprep.subr.mxu1 %v494_v19 }
  0x34   :  { %110 = vmatpush1.xpose.msra.mxu0 %v55_v20  ;;  %361 = vmatpush1.xpose.msra.mxu1 %v55_v20 }
  0x35   :  { %111 = vmatprep.subr.mxu0 %v54_v21  ;;  %346 = vmatprep.subr.mxu1 %v54_v21 }
  0x38   :  { %112 = vmatpush1.xpose.msra.mxu0 %v53_v22  ;;  %362 = vmatpush1.xpose.msra.mxu1 %v53_v22 }
  0x39   :  { %113 = vmatprep.subr.mxu0 %v52_v23  ;;  %347 = vmatprep.subr.mxu1 %v52_v23 }
  0x3c   :  { %114 = vmatpush1.xpose.msra.mxu0 %v51_v24  ;;  %363 = vmatpush1.xpose.msra.mxu1 %v51_v24 }
  0x3d   :  { %115 = vmatprep.subr.mxu0 %v50_v25  ;;  %348 = vmatprep.subr.mxu1 %v50_v25 }
  0x40   :  { %116 = vmatpush1.xpose.msra.mxu0 %v49_v26  ;;  %364 = vmatpush1.xpose.msra.mxu1 %v49_v26 }
  0x41   :  { %117 = vmatprep.subr.mxu0 %v48_v27  ;;  %349 = vmatprep.subr.mxu1 %v48_v27 }
  0x44   :  { %118 = vmatpush1.xpose.msra.mxu0 %v47_v28  ;;  %365 = vmatpush1.xpose.msra.mxu1 %v47_v28 }
  0x45   :  { %119 = vmatprep.subr.mxu0 %v46_v29  ;;  %350 = vmatprep.subr.mxu1 %v46_v29 }
  0x48   :  { %120 = vmatpush1.xpose.msra.mxu0 %v45_v30  ;;  %366 = vmatpush1.xpose.msra.mxu1 %v45_v30 }
  0x49   :  { %121 = vmatprep.subr.mxu0 %v467_v9  ;;  %351 = vmatprep.subr.mxu1 %v467_v9 }
  0x4c   :  { %122 = vmatpush1.xpose.msra.mxu0 %v43_v31  ;;  %367 = vmatpush1.xpose.msra.mxu1 %v43_v31 }
  0x4f   :  { %156 = vmatmul.mubr.f32.vlgmr.msra.gmra.mxu0 %v43_v31  ;;  %196 = vmatmul.mubr.f32.vlgmr.msra.gmra.mxu1 %v59_v16 }
  0x50   :  { %160 = vmatprep.mubr.f32.mxu0 %v46_v29  ;;  %200 = vmatprep.mubr.f32.mxu1 %v62_v14 }
  0x53   :  { %161 = vmatmul.mubr.f32.gmra.mxu0 %v45_v30  ;;  %201 = vmatmul.mubr.f32.gmra.mxu1 %v61_v15 }
  0x54   :  { %165 = vmatprep.mubr.f32.mxu0 %v48_v27  ;;  %205 = vmatprep.mubr.f32.mxu1 %v478_v12 }
  0x57   :  { %166 = vmatmul.mubr.f32.gmra.mxu0 %v47_v28  ;;  %206 = vmatmul.mubr.f32.gmra.mxu1 %v484_v13 }
  0x58   :  { %170 = vmatprep.mubr.f32.mxu0 %v50_v25  ;;  %210 = vmatprep.mubr.f32.mxu1 %v469_v10 }
  0x5b   :  { %171 = vmatmul.mubr.f32.gmra.mxu0 %v49_v26  ;;  %211 = vmatmul.mubr.f32.gmra.mxu1 %v476_v11 }
  0x5c   :  { %175 = vmatprep.mubr.f32.mxu0 %v52_v23  ;;  %215 = vmatprep.mubr.f32.mxu1 %v459_v7 }
  0x5f   :  { %176 = vmatmul.mubr.f32.gmra.mxu0 %v51_v24  ;;  %216 = vmatmul.mubr.f32.gmra.mxu1 %v465_v8 }
  0x60   :  { %180 = vmatprep.mubr.f32.mxu0 %v54_v21  ;;  %220 = vmatprep.mubr.f32.mxu1 %v451_v4 }
  0x63   :  { %181 = vmatmul.mubr.f32.gmra.mxu0 %v53_v22  ;;  %221 = vmatmul.mubr.f32.gmra.mxu1 %v457_v6 }
  0x64   :  { %185 = vmatprep.mubr.f32.mxu0 %v494_v19  ;;  %225 = vmatprep.mubr.f32.mxu1 %v441_v2 }
  0x67   :  { %186 = vmatmul.mubr.f32.gmra.mxu0 %v55_v20  ;;  %226 = vmatmul.mubr.f32.gmra.mxu1 %v449_v3 }
  0x68   :  { %190 = vmatprep.mubr.f32.mxu0 %v488_v17  ;;  %230 = vmatprep.mubr.f32.mxu1 %v437_v0 }
  0x6b   :  { %191 = vmatmul.mubr.f32.gmra.mxu0 %v492_v18  ;;  %231 = vmatmul.mubr.f32.gmra.mxu1 %v439_v1 }
 0x10f   :  { %v157_v32 = vpop.f32.mrf.mxu0  ;;  %v197_v33 = vpop.f32.mrf.mxu1 }
 0x110   :  { %v287_v34 = vmul.f32 0.00048828125, %v157_v32  ;;  %v295_v35 = vmul.f32 0.00048828125, %v197_v33 }
 0x111   :  { %v159_v36 = vpop.f32.mrf.mxu0  ;;  %v199_v37 = vpop.f32.mrf.mxu1 }
 0x112   :  { %303 = vst [vmem:[#allocation6] sm:$0xff] %v287_v34  ;;  %311 = vst [vmem:[#allocation6 + $0x40] sm:$0xff] %v295_v35 }
 0x113   :  { %v162_v38 = vpop.f32.mrf.mxu0  ;;  %v202_v39 = vpop.f32.mrf.mxu1 }
 0x114   :  { %v288_v40 = vmul.f32 0.00048828125, %v162_v38  ;;  %v296_v41 = vmul.f32 0.00048828125, %v202_v39 }
 0x115   :  { %v164_v42 = vpop.f32.mrf.mxu0  ;;  %v204_v43 = vpop.f32.mrf.mxu1 }
 0x116   :  { %304 = vst [vmem:[#allocation6 + $0x8] sm:$0xff] %v288_v40  ;;  %312 = vst [vmem:[#allocation6 + $0x48] sm:$0xff] %v296_v41 }
 0x117   :  { %v167_v44 = vpop.f32.mrf.mxu0  ;;  %v207_v45 = vpop.f32.mrf.mxu1 }
 0x118   :  { %v289_v46 = vmul.f32 0.00048828125, %v167_v44  ;;  %v297_v47 = vmul.f32 0.00048828125, %v207_v45 }
 0x119   :  { %v169_v48 = vpop.f32.mrf.mxu0  ;;  %v209_v49 = vpop.f32.mrf.mxu1 }
 0x11a   :  { %305 = vst [vmem:[#allocation6 + $0x10] sm:$0xff] %v289_v46  ;;  %313 = vst [vmem:[#allocation6 + $0x50] sm:$0xff] %v297_v47 }
 0x11b   :  { %v172_v50 = vpop.f32.mrf.mxu0  ;;  %v212_v51 = vpop.f32.mrf.mxu1 }
 0x11c   :  { %v290_v52 = vmul.f32 0.00048828125, %v172_v50  ;;  %v298_v53 = vmul.f32 0.00048828125, %v212_v51 }
 0x11d   :  { %v174_v54 = vpop.f32.mrf.mxu0  ;;  %v214_v55 = vpop.f32.mrf.mxu1 }
 0x11e   :  { %306 = vst [vmem:[#allocation6 + $0x18] sm:$0xff] %v290_v52  ;;  %314 = vst [vmem:[#allocation6 + $0x58] sm:$0xff] %v298_v53 }
 0x11f   :  { %v177_v56 = vpop.f32.mrf.mxu0  ;;  %v217_v57 = vpop.f32.mrf.mxu1 }
 0x120   :  { %v291_v58 = vmul.f32 0.00048828125, %v177_v56  ;;  %v299_v59 = vmul.f32 0.00048828125, %v217_v57 }
 0x121   :  { %v179_v60 = vpop.f32.mrf.mxu0  ;;  %v219_v61 = vpop.f32.mrf.mxu1 }
 0x122   :  { %307 = vst [vmem:[#allocation6 + $0x20] sm:$0xff] %v291_v58  ;;  %315 = vst [vmem:[#allocation6 + $0x60] sm:$0xff] %v299_v59 }
 0x123   :  { %v182_v62 = vpop.f32.mrf.mxu0  ;;  %v222_v63 = vpop.f32.mrf.mxu1 }
 0x124   :  { %v292_v0 = vmul.f32 0.00048828125, %v182_v62  ;;  %v300_v1 = vmul.f32 0.00048828125, %v222_v63 }
 0x125   :  { %v184_v2 = vpop.f32.mrf.mxu0  ;;  %v224_v3 = vpop.f32.mrf.mxu1 }
 0x126   :  { %308 = vst [vmem:[#allocation6 + $0x28] sm:$0xff] %v292_v0  ;;  %316 = vst [vmem:[#allocation6 + $0x68] sm:$0xff] %v300_v1 }
 0x127   :  { %v187_v4 = vpop.f32.mrf.mxu0  ;;  %v227_v5 = vpop.f32.mrf.mxu1 }
 0x128   :  { %v293_v6 = vmul.f32 0.00048828125, %v187_v4  ;;  %v301_v7 = vmul.f32 0.00048828125, %v227_v5 }
 0x129   :  { %v189_v8 = vpop.f32.mrf.mxu0  ;;  %v229_v9 = vpop.f32.mrf.mxu1 }
 0x12a   :  { %309 = vst [vmem:[#allocation6 + $0x30] sm:$0xff] %v293_v6  ;;  %317 = vst [vmem:[#allocation6 + $0x70] sm:$0xff] %v301_v7 }
 0x12b   :  { %v192_v10 = vpop.f32.mrf.mxu0  ;;  %v232_v11 = vpop.f32.mrf.mxu1 }
 0x12c   :  { %v294_v12 = vmul.f32 0.00048828125, %v192_v10  ;;  %v302_v13 = vmul.f32 0.00048828125, %v232_v11 }
 0x12d   :  { %v194_v14 = vpop.f32.mrf.mxu0  ;;  %v234_v15 = vpop.f32.mrf.mxu1 }
 0x12e   :  { %310 = vst [vmem:[#allocation6 + $0x38] sm:$0xff] %v294_v12  ;;  %318 = vst [vmem:[#allocation6 + $0x78] sm:$0xff] %v302_v13 }
 0x12f   :  { %405 = shalt.err (!%p402_p9)
}
 0x130   :  { %s422_s15 = smov 128   ;;  %s423_s16 = smov 8  }
 0x131   :  { %330 = dma.vmem_to_hbm [thread:$0]  %s325_s13, 2048, %s521_s1, [#allocation5], %s422_s15, %s422_s15, %s423_s16  }
 0x132   :  { %416 = dma.done.wait [#allocation5], 2048  }
 0x133   :  { %417 = vsyncadd [#allocation5], 4294965248 }
 0x134   :  { %334 = vsyncpa [#allocation4], 1 }
 0x135   :  { %335 = vsyncpa [#allocation5], 1 }

</bundles_post_ra>
